<compile_context>
chip_gen: v7x
topology: tpu7x:2x2x1
jax: 0.10.0
libtpu: 0.0.40
codegen_flags: <defaults>
</compile_context>

<pallas_src>
import functools

import numpy as np
import jax
import jax.numpy as jnp
from jax.experimental import pallas as pl
from jax.experimental.pallas import tpu as pltpu


# ----------------------------------------------------------------------------
# helpers
# ----------------------------------------------------------------------------
def _round_up(x, m):
    return (x + m - 1) // m * m


def _pick_tile(n, target, align):
    """Largest divisor of n that is a multiple of `align` and <= target; else n
    (a block equal to the full dim always satisfies the (8,128) rule)."""
    best = 0
    d = 1
    while d <= min(n, target):
        if n % d == 0 and d % align == 0:
            best = d
        d += 1
    return best if best > 0 else n


# ----------------------------------------------------------------------------
# Kernel 1: pairwise squared distances  dist[b,i,j] = || pos[b,i] - pos[b,j] ||^2
# Tiled over (B, i-tile, j-tile); j (lanes) is the dense axis.  Per coordinate
# p we accumulate (pi[:,p] - pjT[p,:])^2 on lane-dense (ti, tj) vregs — exact
# f32, no (ti, tj, 3) intermediate, no cross-lane reduction.
# ----------------------------------------------------------------------------
def _sqdist_kernel(pi_ref, pjt_ref, out_ref):
    pi = pi_ref[0]          # (ti, P) f32
    pjt = pjt_ref[0]        # (P, tj) f32
    P = pi.shape[1]
    d = pi[:, 0:1] - pjt[0:1, :]          # (ti, tj) broadcasted
    acc = d * d
    for p in range(1, P):                 # static unroll, P == 3
        d = pi[:, p:p + 1] - pjt[p:p + 1, :]
        acc = acc + d * d
    out_ref[0] = acc


def pairwise_sqdist(pos, *, tile_i=256, tile_j=512):
    B, N, P = pos.shape
    pos = pos.astype(jnp.float32)
    pos_t = jnp.transpose(pos, (0, 2, 1))          # (B, P, N)
    ti = _pick_tile(N, tile_i, 8)
    tj = _pick_tile(N, tile_j, 128)
    grid = (B, N // ti, N // tj)
    return pl.pallas_call(
        _sqdist_kernel,
        out_shape=jax.ShapeDtypeStruct((B, N, N), jnp.float32),
        grid=grid,
        in_specs=[
            pl.BlockSpec((1, ti, P), lambda b, i, j: (b, i, 0)),
            pl.BlockSpec((1, P, tj), lambda b, i, j: (b, 0, j)),
        ],
        out_specs=pl.BlockSpec((1, ti, tj), lambda b, i, j: (b, i, j)),
        compiler_params=pltpu.CompilerParams(
            dimension_semantics=("parallel", "parallel", "parallel")),
    )(pos, pos_t)


# ----------------------------------------------------------------------------
# Kernel 2: fused PointWeb body (per row-tile of B*N points).
# Input block layout (built in the wrapper): [tm*K relative rows | tm self rows]
# with channels zero-padded to 128 lanes, bf16.  One shared weights_net pass
# covers both the relative and the self rows; the K-sum is reshape + sum.
# ----------------------------------------------------------------------------
def _pointweb_kernel(last_act,
                     cat_ref,
                     w1_ref, b1_ref, w2_ref, b2_ref,
                     m1_ref, c1_ref, m2_ref, c2_ref,
                     out_ref):
    f_bf = cat_ref[...]                      # (tm*(K+1), C) bf16
    tm = out_ref.shape[0]
    rows, C = f_bf.shape
    K = rows // tm - 1
    tmk = tm * K

    # --- feat_diff_to_weights_net (Conv+BN+ReLU, Conv+BN; BN folded) ---------
    h = jnp.dot(f_bf, w1_ref[...], preferred_element_type=jnp.float32) + b1_ref[...]
    h = jnp.maximum(h, 0.0)
    z = jnp.dot(h.astype(jnp.bfloat16), w2_ref[...],
                preferred_element_type=jnp.float32) + b2_ref[...]
    # sigmoid: exp on the EUP + approx reciprocal on the EUP (no VALU divide).
    w_all = pl.reciprocal(1.0 + jnp.exp(-z), approx=True)       # (rows, C) f32

    # --- res = self + w_self*self - sum_k(rel * w_rel) -----------------------
    f32 = f_bf.astype(jnp.float32)
    prod = f32 * w_all                       # (rows, C); self rows give w_self*self
    sx = f32[tmk:, :]                        # (tm, C)  self features
    self_term = prod[tmk:, :]                # (tm, C)  w_self * self
    agg = jnp.sum(prod[:tmk, :].reshape(tm, K, C), axis=1)       # (tm, C)
    res = sx + self_term - agg

    # --- feat_mlp_net (Conv+BN+ReLU, Conv+BN[, ReLU]) ------------------------
    h2 = jnp.dot(res.astype(jnp.bfloat16), m1_ref[...],
                 preferred_element_type=jnp.float32) + c1_ref[...]
    h2 = jnp.maximum(h2, 0.0)
    out = jnp.dot(h2.astype(jnp.bfloat16), m2_ref[...],
                  preferred_element_type=jnp.float32) + c2_ref[...]
    if last_act:
        out = jnp.maximum(out, 0.0)
    # torch.max over the size-1 neighbor dim of res_x is an identity here.
    out_ref[...] = out


def pointweb_fused(rel_feat, self_feat, params, *, last_act=False, row_tile=256):
    """rel_feat: (B, N, K, Cin) f32; self_feat: (B, N, Cin) f32 -> (B, N, Cout)."""
    B, N, K, Cin = rel_feat.shape
    Cout = params["m2w"].shape[1]
    assert params["w2w"].shape[1] == Cin, \
        "reference multiplies weights elementwise with rel_feat -> out_feat_dim == in_feat_dim"

    Cpad = _round_up(max(Cin, Cout), 128)     # lane-dense channels
    BN = B * N
    tm = _pick_tile(BN, row_tile, 16)         # rows of points per grid step
    n_tiles = BN // tm

    def pad_c(a):
        return jnp.pad(a, [(0, 0)] * (a.ndim - 1) + [(0, Cpad - a.shape[-1])])

    # Per-tile layout: [tm*K relative rows | tm self rows], bf16, 128-lane padded.
    rel_t = pad_c(rel_feat).reshape(n_tiles, tm * K, Cpad)
    self_t = pad_c(self_feat).reshape(n_tiles, tm, Cpad)
    cat = jnp.concatenate([rel_t, self_t], axis=1)       # (n_tiles, tm*(K+1), Cpad)
    cat = cat.reshape(n_tiles * tm * (K + 1), Cpad).astype(jnp.bfloat16)

    def pad_w(w):   # (cin, cout) -> (Cpad, Cpad) bf16, zero padded
        return jnp.pad(w, ((0, Cpad - w.shape[0]),
                           (0, Cpad - w.shape[1]))).astype(jnp.bfloat16)

    def pad_b(b):   # (1, cout) -> (1, Cpad) f32
        return pad_c(b).astype(jnp.float32)

    weight_spec = pl.BlockSpec((Cpad, Cpad), lambda m: (0, 0))
    bias_spec = pl.BlockSpec((1, Cpad), lambda m: (0, 0))

    out2d = pl.pallas_call(
        functools.partial(_pointweb_kernel, last_act),
        out_shape=jax.ShapeDtypeStruct((BN, Cpad), jnp.float32),
        grid=(n_tiles,),
        in_specs=[
            pl.BlockSpec((tm * (K + 1), Cpad), lambda m: (m, 0)),
            weight_spec, bias_spec, weight_spec, bias_spec,
            weight_spec, bias_spec, weight_spec, bias_spec,
        ],
        out_specs=pl.BlockSpec((tm, Cpad), lambda m: (m, 0)),
        compiler_params=pltpu.CompilerParams(
            dimension_semantics=("parallel",),
            vmem_limit_bytes=32 * 1024 * 1024),
    )(cat,
      pad_w(params["w1w"]), pad_b(params["w1b"]),
      pad_w(params["w2w"]), pad_b(params["w2b"]),
      pad_w(params["m1w"]), pad_b(params["m1b"]),
      pad_w(params["m2w"]), pad_b(params["m2b"]))

    return out2d.reshape(B, N, Cpad)[:, :, :Cout]


# ----------------------------------------------------------------------------
# Glue: params (Conv2d 1x1 + BatchNorm folded), KNN gather, feature assembly.
# ----------------------------------------------------------------------------
def init_params(key, in_feat_dim, out_feat_dim):
    """Deterministic Conv2d(1x1)+BN params, BN folded into (W, b) (inference)."""
    def conv_bn(k, cin, cout):
        kw, kb, kg, kbe = jax.random.split(k, 4)
        w = jax.random.normal(kw, (cin, cout), jnp.float32) / jnp.sqrt(cin)
        b = 0.1 * jax.random.normal(kb, (cout,), jnp.float32)
        gamma = 1.0 + 0.1 * jax.random.normal(kg, (cout,), jnp.float32)
        beta = 0.1 * jax.random.normal(kbe, (cout,), jnp.float32)
        mean = jnp.zeros((cout,), jnp.float32)
        var = jnp.ones((cout,), jnp.float32)
        scale = gamma / jnp.sqrt(var + 1e-5)
        return w * scale[None, :], ((b - mean) * scale + beta).reshape(1, cout)

    ks = jax.random.split(key, 4)
    # feat_diff_to_weights_net: Conv+BN+ReLU, Conv+BN (last_act=False)
    w1w, w1b = conv_bn(ks[0], in_feat_dim, out_feat_dim)
    w2w, w2b = conv_bn(ks[1], out_feat_dim, out_feat_dim)
    # feat_mlp_net: Conv+BN+ReLU, Conv+BN (+ReLU iff last_act)
    m1w, m1b = conv_bn(ks[2], in_feat_dim, out_feat_dim)
    m2w, m2b = conv_bn(ks[3], out_feat_dim, out_feat_dim)
    return dict(w1w=w1w, w1b=w1b, w2w=w2w, w2b=w2b,
                m1w=m1w, m1b=m1b, m2w=m2w, m2b=m2b)


def build_neighborhood_features(x, pos, k):
    """sampled_idx=None path: KNN by position, gather, relative features."""
    B, N, _ = x.shape
    P = pos.shape[-1]
    dist = pairwise_sqdist(pos)                       # (B, N, N)  (Pallas)
    # TODO(synk): torch.topk(largest=False) tie-breaking order is unspecified;
    # top-k + gather are index plumbing with no clean Pallas primitive -> plain JAX.
    _, knn_idx = jax.lax.top_k(-dist, k)              # k smallest distances
    gather = jax.vmap(lambda v, i: v[i])              # batched_index_select(dim=1)
    g_pos = gather(pos, knn_idx)                      # (B, N, k, P)
    g_x = gather(x, knn_idx)                          # (B, N, k, F)
    rel_pos = g_pos - pos[:, :, None, :]
    rel_x = g_x - x[:, :, None, :]
    rel_feat = jnp.concatenate([rel_x, rel_pos], axis=-1)        # (B, N, k, F+P)
    # TODO(synk): reference feeds raw sampled_x (F channels) into a net built
    # for in_feat_dim = F+P channels; we zero-pad the P relative-pos channels
    # (a point's offset to itself is 0) to make the reference shapes consistent.
    self_feat = jnp.concatenate([x, jnp.zeros((B, N, P), x.dtype)], axis=-1)
    return rel_feat, self_feat


def pointweb_conv_forward(x, pos, params, *, k=16, last_act=False):
    rel_feat, self_feat = build_neighborhood_features(x, pos, k)
    return pointweb_fused(rel_feat, self_feat, params, last_act=last_act)


# ----------------------------------------------------------------------------
# Pure-JAX references (mimic the kernel's bf16-operand / f32-accumulate matmuls).
# ----------------------------------------------------------------------------
def _mlp_ref(t, w1, b1, w2, b2, relu_last):
    def mm(a, w):
        return jnp.dot(a.astype(jnp.bfloat16), w.astype(jnp.bfloat16),
                       preferred_element_type=jnp.float32)
    h = jnp.maximum(mm(t, w1) + b1, 0.0)
    o = mm(h, w2) + b2
    return jnp.maximum(o, 0.0) if relu_last else o


def fused_reference(rel_feat, self_feat, params, last_act):
    w = jax.nn.sigmoid(_mlp_ref(rel_feat, params["w1w"], params["w1b"],
                                params["w2w"], params["w2b"], False))
    ws = jax.nn.sigmoid(_mlp_ref(self_feat, params["w1w"], params["w1b"],
                                 params["w2w"], params["w2b"], False))
    res = self_feat + ws * self_feat - jnp.sum(rel_feat * w, axis=2)
    return _mlp_ref(res, params["m1w"], params["m1b"],
                    params["m2w"], params["m2b"], last_act)


if __name__ == "__main__":
    key = jax.random.PRNGKey(0)
    kx, kp, kparam = jax.random.split(key, 3)

    B, N, P = 2, 64, 3
    K = 16
    in_feat_dim = 16            # = feat_dim + P (see note above)
    out_feat_dim = 16           # reference requires out_feat_dim == in_feat_dim
    feat_dim = in_feat_dim - P

    x = jax.random.normal(kx, (B, N, feat_dim), jnp.float32)
    pos = jax.random.normal(kp, (B, N, P), jnp.float32)
    params = init_params(kparam, in_feat_dim, out_feat_dim)

    # End-to-end forward (Pallas distance kernel + Pallas fused kernel).
    out = pointweb_conv_forward(x, pos, params, k=K, last_act=False)
    out = jax.block_until_ready(out)
    assert out.shape == (B, N, out_feat_dim)

    # Check kernel 1 against plain JAX (both exact f32 -> tight tolerance).
    dist_ref = jnp.sum((pos[:, :, None, :] - pos[:, None, :, :]) ** 2, axis=-1)
    np.testing.assert_allclose(np.asarray(pairwise_sqdist(pos)),
                               np.asarray(dist_ref), atol=1e-4, rtol=1e-4)

    # Check kernel 2 against plain JAX on identical gathered features.
    # The reference sees the same bf16-quantized features/weights the kernel uses;
    # remaining deltas are accumulation order + the approx-reciprocal sigmoid.
    rel_feat, self_feat = build_neighborhood_features(x, pos, K)
    rel_q = rel_feat.astype(jnp.bfloat16).astype(jnp.float32)
    self_q = self_feat.astype(jnp.bfloat16).astype(jnp.float32)
    out_kernel = pointweb_fused(rel_feat, self_feat, params, last_act=False)
    out_ref = fused_reference(rel_q, self_q, params, last_act=False)
    np.testing.assert_allclose(np.asarray(out_kernel), np.asarray(out_ref),
                               atol=5e-2, rtol=5e-2)

    print("KERNEL_OK")
</pallas_src>

<mosaic_0001>
module attributes {stable_mosaic.version = 11 : i64} {
  func.func @_sqdist_kernel(%arg0: i32, %arg1: i32, %arg2: i32, %arg3: memref<1x64x3xf32, #tpu.memory_space<vmem>>, %arg4: memref<1x3x64xf32, #tpu.memory_space<vmem>>, %arg5: memref<1x64x64xf32, #tpu.memory_space<vmem>>) attributes {dimension_semantics = [#tpu.dimension_semantics<parallel>, #tpu.dimension_semantics<parallel>, #tpu.dimension_semantics<parallel>], iteration_bounds = array<i64: 2, 1, 1>, scalar_prefetch = 0 : i64, scratch_operands = 0 : i64, tpu.core_type = #tpu.core_type<tc>, window_params = [{transform_indices = @transform_0, window_bounds = array<i64: 1, 64, 3>}, {transform_indices = @transform_1, window_bounds = array<i64: 1, 3, 64>}, {transform_indices = @transform_2, window_bounds = array<i64: 1, 64, 64>}]} {
    %c0 = arith.constant 0 : index
    %c0_0 = arith.constant 0 : index
    %c0_1 = arith.constant 0 : index
    %0 = vector.load %arg3[%c0, %c0_0, %c0_1] : memref<1x64x3xf32, #tpu.memory_space<vmem>>, vector<1x64x3xf32>
    %1 = vector.shape_cast %0 : vector<1x64x3xf32> to vector<64x3xf32>
    %c0_2 = arith.constant 0 : index
    %c0_3 = arith.constant 0 : index
    %c0_4 = arith.constant 0 : index
    %2 = vector.load %arg4[%c0_2, %c0_3, %c0_4] : memref<1x3x64xf32, #tpu.memory_space<vmem>>, vector<1x3x64xf32>
    %3 = vector.shape_cast %2 : vector<1x3x64xf32> to vector<3x64xf32>
    %4 = vector.extract_strided_slice %1 {offsets = [0, 0], sizes = [64, 1], strides = [1, 1]} : vector<64x3xf32> to vector<64x1xf32>
    %5 = vector.extract_strided_slice %3 {offsets = [0, 0], sizes = [1, 64], strides = [1, 1]} : vector<3x64xf32> to vector<1x64xf32>
    %6 = vector.broadcast %4 : vector<64x1xf32> to vector<64x64xf32>
    %7 = vector.broadcast %5 : vector<1x64xf32> to vector<64x64xf32>
    %8 = arith.subf %6, %7 : vector<64x64xf32>
    %9 = arith.mulf %8, %8 : vector<64x64xf32>
    %10 = vector.extract_strided_slice %1 {offsets = [0, 1], sizes = [64, 1], strides = [1, 1]} : vector<64x3xf32> to vector<64x1xf32>
    %11 = vector.extract_strided_slice %3 {offsets = [1, 0], sizes = [1, 64], strides = [1, 1]} : vector<3x64xf32> to vector<1x64xf32>
    %12 = vector.broadcast %10 : vector<64x1xf32> to vector<64x64xf32>
    %13 = vector.broadcast %11 : vector<1x64xf32> to vector<64x64xf32>
    %14 = arith.subf %12, %13 : vector<64x64xf32>
    %15 = arith.mulf %14, %14 : vector<64x64xf32>
    %16 = arith.addf %9, %15 : vector<64x64xf32>
    %17 = vector.extract_strided_slice %1 {offsets = [0, 2], sizes = [64, 1], strides = [1, 1]} : vector<64x3xf32> to vector<64x1xf32>
    %18 = vector.extract_strided_slice %3 {offsets = [2, 0], sizes = [1, 64], strides = [1, 1]} : vector<3x64xf32> to vector<1x64xf32>
    %19 = vector.broadcast %17 : vector<64x1xf32> to vector<64x64xf32>
    %20 = vector.broadcast %18 : vector<1x64xf32> to vector<64x64xf32>
    %21 = arith.subf %19, %20 : vector<64x64xf32>
    %22 = arith.mulf %21, %21 : vector<64x64xf32>
    %23 = arith.addf %16, %22 : vector<64x64xf32>
    %c0_5 = arith.constant 0 : index
    %c0_6 = arith.constant 0 : index
    %c0_7 = arith.constant 0 : index
    %24 = vector.load %arg5[%c0_5, %c0_6, %c0_7] : memref<1x64x64xf32, #tpu.memory_space<vmem>>, vector<1x64x64xf32>
    %25 = vector.shape_cast %24 : vector<1x64x64xf32> to vector<64x64xf32>
    %26 = vector.shape_cast %23 : vector<64x64xf32> to vector<1x64x64xf32>
    tpu.vector_store %arg5[%c0_5, %c0_6, %c0_7], %26 {strides = array<i32>} : memref<1x64x64xf32, #tpu.memory_space<vmem>>, vector<1x64x64xf32>,
    return
  }
  func.func @transform_0(%arg0: i32, %arg1: i32, %arg2: i32) -> (i32, i32, i32) {
    %c0_i32 = arith.constant 0 : i32
    %c0_i32_0 = arith.constant 0 : i32
    return %arg0, %arg1, %c0_i32 : i32, i32, i32
  }
  func.func @transform_1(%arg0: i32, %arg1: i32, %arg2: i32) -> (i32, i32, i32) {
    %c0_i32 = arith.constant 0 : i32
    %c0_i32_0 = arith.constant 0 : i32
    return %arg0, %c0_i32, %arg2 : i32, i32, i32
  }
  func.func @transform_2(%arg0: i32, %arg1: i32, %arg2: i32) -> (i32, i32, i32) {
    %c0_i32 = arith.constant 0 : i32
    return %arg0, %arg1, %arg2 : i32, i32, i32
  }
}

</mosaic_0001>

<bundles_post_ra>
// kernel: tpu_custom_call.1
= control target key start
LH: loop header
LB: loop body
LE: loop exit
PB: predicated region body
PF: predicated region fallthrough
CT: control target
= control target key end

     0   :  { %7 = vsyncpa [#allocation3], 0  ;;  %s887_s0 = inlined_call_operand.vmem [shape: f32[2,64,3], index: 0, kind: input, shape index: {}]   ;;  %s888_s1 = inlined_call_operand.vmem [shape: f32[2,3,64], index: 1, kind: input, shape index: {}]   ;;  %s889_s2 = inlined_call_operand.hbm [shape: f32[2,64,64], index: 2, kind: output, shape index: {}]  }
   0x1   :  { %9 = vsyncpa [#allocation3 + $0x1], 0  ;;  %s706_s9 = smov 0   ;;  %s708_s10 = smov 0  }
   0x2   :  { %s710_s11 = smov 0   ;;  %s712_s12 = smov 0  }
   0x3   :  { %s714_s13 = smov 0   ;;  %s716_s14 = smov 0  }
   0x4 LB: > { %s523_s15 = sadd.s32 4294967295, %s683_s14   ;;  %s524_s16 = sadd.s32 4294967294, %s683_s14   ;;  %s683_s14 = sphi %s716_s14, %s15_s14   ;;  %s679_s13 = sphi %s714_s13, %s896_s13   ;;  %s675_s12 = sphi %s712_s12, %s895_s12   ;;  %s671_s11 = sphi %s710_s11, %s894_s11   ;;  %s667_s10 = sphi %s708_s10, %s893_s10   ;;  %s663_s9 = sphi %s706_s9, %s892_s9  }
   0x5   : > { %s34_s17 = sadd.s32 1, %s679_s13  ;;  %s101_s18 = sadd.s32 1, %s671_s11 }
   0x6   : > { %p36_p0 = scmp.ge.s32.totalorder %s34_s17, 2  ;;  %p111_p1 = scmp.ne.s32.totalorder %s671_s11, %s667_s10 }
   0x7   : > { %p112_p2 = scmp.eq.s32.totalorder %s523_s15, 1  ;;  %p117_p3 = scmp.ne.s32.totalorder %s667_s10, %s663_s9 }
   0x8   : > { %s898_s17 = smov (%p36_p0, %s34_s17), 0  ;;  %p118_p5 = scmp.eq.s32.totalorder %s524_s16, 1 }
   0x9   : > { %p746_p4 = por %p112_p2, %p111_p1  ;;  %s94_s20 = ssub.s32 %s679_s13, %s898_s17 }
   0xa   : > { %p527_p6 = scmp.ge.s32.totalorder %s683_s14, 1  ;;  %p99_p7 = scmp.eq.s32.totalorder %s94_s20, 0 }
   0xb   : > { %p753_p8 = por %p118_p5, %p117_p3  ;;  %p159_p9 = scmp.lt.s32.totalorder %s683_s14, 3 }
   0xc   : > { %s759_s22 = scalar_select %p99_p7, %s671_s11, %s101_s18  }
   0xd   : > { %p160_p10 = pnand %p527_p6, %p159_p9 }
   0xe   : > { %p193_p11 = scmp.lt.s32.totalorder (!%p160_p10), %s675_s12, 1  ;;  %v685_v0 = vmov (!%p160_p10), 0   ;;  %v686_v9 = vmov (!%p160_p10), 1   ;;  %v687_v10 = vmov (!%p160_p10), 2   ;;  %v259_v19 = vlaneseq (!%p160_p10)  ;;  %s189_s4 = sand.u32 (!%p160_p10), 1, %s667_s10  }
   0xf   : > { %163 = sbr.rel (%p160_p10) target bundleno = 226 (0xe2), region = 28  ;;  %600 = vset.pattern.permute.xlu1 (!%p160_p10), %v685_v0  ;;  %599 = vset.pattern.permute.xlu0 (!%p160_p10), %v685_v0  ;;  %vm399_vm0 = vcmask (!%p160_p10), 523264   ;;  %s528_s5 = sshll.u32 (!%p160_p10), %s189_s4, 6 }
  0x10   : > { %v260_v22 = vshrl.u32 (!%p160_p10), %v259_v19, 7  ;;  %s803_s6 = scalar_lea.vmem (!%p160_p10), [#allocation2], %s528_s5  ;;  %s538_s7 = sshll.u32 (!%p160_p10), %s675_s12, 10 }
  0x11   : > { %s425_s8 = sshll.u32 (!%p160_p10), %s803_s6, 4  ;;  %s833_s18 = scalar_lea.hbm (!%p160_p10), %s889_s2, %s538_s7  ;;  %s835_s8 = int_to_ptr.vmem [resolvable:$true] %s425_s8 }
  0x12   : > { %v313_v23 = vsub.s32 (!%p160_p10), 1, %v260_v22  ;;  %v261_v27 = vsub.s32 (!%p160_p10), 0, %v260_v22  ;;  %v373_v31 = vsub.s32 (!%p160_p10), 2, %v260_v22  ;;  %s605_s20 = scalar_lea.vmem (!%p160_p10), %s835_s8, 1024 }
  0x13   : > { %p606_p12 = scmp.ne.s32.totalorder (!%p160_p10), %s835_s8, %s605_s20 }
  0x15   : > { %p607_p13 = pnand (!%p160_p10), %p606_p12, %p746_p4 }
  0x16   : > { %s763_s23 = scalar_select %p193_p11, %s675_s12, 1 }
  0x17   : > { %s841_s12 = scalar_lea.sflag [#allocation3], %s189_s4  ;;  %p608_p0 = pneg %p607_p13 }
  0x18   : > { %s537_s24 = sshll.u32 %s763_s23, 6  ;;  %s531_s28 = sshll.u32 %s763_s23, 2 }
  0x19   : > { %s200_s27 = scalar_lea.vmem %s887_s0, %s537_s24  ;;  %s208_s3 = scalar_lea.vmem %s888_s1, %s531_s28 }
  0x1a   : > { %v212_v1 = vld [vmem:[%s200_s27 + $0x10] sm:$0xff]  ;;  %v210_v2 = vld [vmem:[%s200_s27] sm:$0xff]  ;;  %v213_v3 = vld [vmem:[%s200_s27 + $0x18] sm:$0xff]  ;;  %s688_s23 = smov [#allocation2]  }
  0x1b   : > { %231 = vperm.xlu1 %600, %v212_v1   ;;  %221 = vperm.xlu0 %599, %v210_v2   ;;  %v211_v4 = vld [vmem:[%s200_s27 + $0x8] sm:$0xff]  ;;  %v214_v6 = vld [vmem:[%s200_s27 + $0x20] sm:$0xff]  ;;  %v217_v7 = vld [vmem:[%s200_s27 + $0x38] sm:$0xff]  ;;  %s609_s24 = sshll.u32 %s688_s23, 4  ;;  %s610_s24 = int_to_ptr.vmem [resolvable:$false] %s609_s24 }
  0x1c   : > { %v215_v5 = vld [vmem:[%s200_s27 + $0x28] sm:$0xff]  ;;  %v216_v8 = vld [vmem:[%s200_s27 + $0x30] sm:$0xff]  ;;  %v218_v26 = vld [vmem:[%s208_s3] sm:$0x7]  ;;  %s611_s25 = scalar_lea.vmem %s610_s24, 2048  ;;  %p612_p1 = scmp.lt.s32.totalorder %s835_s8, %s610_s24 }
  0x1d   : > { %v777_v28 = vrot.slane %v218_v26, %v313_v23  ;;  %v779_v32 = vrot.slane %v218_v26, %v261_v27  ;;  %v785_v39 = vrot.slane %v218_v26, %v373_v31  ;;  %p613_p2 = scmp.lt.s32.totalorder %s611_s25, %s605_s20 }
  0x1f   : > { %236 = vperm.xlu1 %600, %v213_v3   ;;  %226 = vperm.xlu0 %599, %v211_v4   ;;  %p614_p3 = por %p613_p2, %p612_p1 }
  0x21   : > { %p615_p5 = pnand %p614_p3, %p608_p0 }
  0x23   : > { %246 = vperm.xlu1 %600, %v215_v5   ;;  %241 = vperm.xlu0 %599, %v214_v6  }
  0x27   : > { %256 = vperm.xlu1 %600, %v217_v7   ;;  %251 = vperm.xlu0 %599, %v216_v8  }
  0x2b   : > { %602 = vset.pattern.permute.xlu1 %v686_v9  ;;  %601 = vset.pattern.permute.xlu0 %v686_v9 }
  0x2c   : > { %284 = vperm.xlu1 %602, %v211_v4   ;;  %280 = vperm.xlu0 %601, %v210_v2  }
  0x30   : > { %288 = vperm.xlu1 %602, %v212_v1   ;;  %292 = vperm.xlu0 %601, %v213_v3  }
  0x34   : > { %296 = vperm.xlu1 %602, %v214_v6   ;;  %300 = vperm.xlu0 %601, %v215_v5  }
  0x38   : > { %304 = vperm.xlu1 %602, %v216_v8   ;;  %308 = vperm.xlu0 %601, %v217_v7  }
  0x3c   : > { %603 = vset.pattern.permute.xlu1 %v687_v10  ;;  %604 = vset.pattern.permute.xlu0 %v687_v10 }
  0x3d   : > { %340 = vperm.xlu1 %603, %v210_v2   ;;  %344 = vperm.xlu0 %604, %v211_v4  }
  0x41   : > { %348 = vperm.xlu1 %603, %v212_v1   ;;  %356 = vperm.xlu0 %604, %v214_v6  }
  0x45   : > { %352 = vperm.xlu1 %603, %v213_v3   ;;  %364 = vperm.xlu0 %604, %v216_v8  }
  0x49   : > { %360 = vperm.xlu1 %603, %v215_v5  }
  0x4d   : > { %368 = vperm.xlu1 %603, %v217_v7  }
  0x9a   : > { %v232_v11 = vpop.permute.xlu1 %231  ;;  %v222_v12 = vpop.permute.xlu0 %221 }
  0x9b   : > { %v263_v37 = vsub.f32 %v222_v12, %v779_v32  ;;  %v265_v44 = vsub.f32 %v232_v11, %v779_v32 }
  0x9d   : > { %v271_v45 = vmul.f32 %v263_v37, %v263_v37  ;;  %v273_v60 = vmul.f32 %v265_v44, %v265_v44 }
  0x9e   : > { %v237_v13 = vpop.permute.xlu1 %236  ;;  %v227_v14 = vpop.permute.xlu0 %226 }
  0x9f   : > { %v264_v38 = vsub.f32 %v227_v14, %v779_v32  ;;  %v266_v61 = vsub.f32 %v237_v13, %v779_v32 }
  0xa1   : > { %v272_v46 = vmul.f32 %v264_v38, %v264_v38  ;;  %v274_v13 = vmul.f32 %v266_v61, %v266_v61 }
  0xa2   : > { %v769_v15 = vpop.permute.xlu1 %246  ;;  %v242_v16 = vpop.permute.xlu0 %241 }
  0xa3   : > { %v267_v47 = vsub.f32 %v242_v16, %v779_v32  ;;  %v268_v14 = vsub.f32 %v769_v15, %v779_v32 }
  0xa5   : > { %v275_v62 = vmul.f32 %v267_v47, %v267_v47 }
  0xa6   : > { %v771_v17 = vpop.permute.xlu1 %256  ;;  %v252_v18 = vpop.permute.xlu0 %251 }
  0xa7   : > { %v269_v63 = vsub.f32 %v252_v18, %v779_v32 }
  0xa9   : > { %v277_v16 = vmul.f32 %v269_v63, %v269_v63 }
  0xab   : > { %v285_v20 = vpop.permute.xlu1 %284  ;;  %v281_v21 = vpop.permute.xlu0 %280 }
  0xac   : > { %v316_v33 = vsub.f32 %v285_v20, %v777_v28  ;;  %v315_v34 = vsub.f32 %v281_v21, %v777_v28 }
  0xae   : > { %v324_v40 = vmul.f32 %v316_v33, %v316_v33  ;;  %v323_v41 = vmul.f32 %v315_v34, %v315_v34  ;;  %v270_v33 = vsub.f32 %v771_v17, %v779_v32 }
  0xaf   : > { %v289_v24 = vpop.permute.xlu1 %288  ;;  %v293_v25 = vpop.permute.xlu0 %292 }
  0xb0   : > { %v317_v42 = vsub.f32 %v289_v24, %v777_v28  ;;  %v332_v52 = vadd.f32 %v324_v40, %v272_v46  ;;  %v331_v53 = vadd.f32 %v323_v41, %v271_v45  ;;  %v318_v55 = vsub.f32 %v293_v25, %v777_v28 }
  0xb1   : > { %v278_v41 = vmul.f32 %v270_v33, %v270_v33 }
  0xb2   : > { %v325_v54 = vmul.f32 %v317_v42, %v317_v42  ;;  %v326_v7 = vmul.f32 %v318_v55, %v318_v55 }
  0xb3   : > { %v297_v29 = vpop.permute.xlu1 %296  ;;  %v301_v30 = vpop.permute.xlu0 %300 }
  0xb4   : > { %v319_v43 = vsub.f32 %v297_v29, %v777_v28  ;;  %v333_v6 = vadd.f32 %v325_v54, %v273_v60  ;;  %v320_v8 = vsub.f32 %v301_v30, %v777_v28  ;;  %v334_v24 = vadd.f32 %v326_v7, %v274_v13 }
  0xb5   : > { %v276_v30 = vmul.f32 %v268_v14, %v268_v14 }
  0xb6   : > { %v327_v56 = vmul.f32 %v319_v43, %v319_v43  ;;  %v328_v25 = vmul.f32 %v320_v8, %v320_v8 }
  0xb7   : > { %v305_v35 = vpop.permute.xlu1 %304  ;;  %v309_v36 = vpop.permute.xlu0 %308 }
  0xb8   : > { %v321_v57 = vsub.f32 %v305_v35, %v777_v28  ;;  %v335_v9 = vadd.f32 %v327_v56, %v275_v62  ;;  %v322_v27 = vsub.f32 %v309_v36, %v777_v28  ;;  %v336_v38 = vadd.f32 %v328_v25, %v276_v30 }
  0xba   : > { %v329_v10 = vmul.f32 %v321_v57, %v321_v57  ;;  %v330_v28 = vmul.f32 %v322_v27, %v322_v27 }
  0xbc   : > { %v341_v48 = vpop.permute.xlu1 %340  ;;  %v345_v49 = vpop.permute.xlu0 %344  ;;  %v337_v26 = vadd.f32 %v329_v10, %v277_v16  ;;  %v338_v32 = vadd.f32 %v330_v28, %v278_v41 }
  0xbd   : > { %v375_v50 = vsub.f32 %v341_v48, %v785_v39  ;;  %v376_v51 = vsub.f32 %v345_v49, %v785_v39 }
  0xbf   : > { %v383_v58 = vmul.f32 %v375_v50, %v375_v50  ;;  %v384_v59 = vmul.f32 %v376_v51, %v376_v51 }
  0xc0   : > { %v349_v0 = vpop.permute.xlu1 %348  ;;  %v357_v1 = vpop.permute.xlu0 %356 }
  0xc1   : > { %v391_v2 = vadd.f32 %v383_v58, %v331_v53  ;;  %v392_v3 = vadd.f32 %v384_v59, %v332_v52  ;;  %v377_v4 = vsub.f32 %v349_v0, %v785_v39  ;;  %v379_v5 = vsub.f32 %v357_v1, %v785_v39 }
  0xc3   : > { %400 = vst.msk [vmem:[%s803_s6] sm:$0xff] %vm399_vm0, %v391_v2  ;;  %401 = vst.msk [vmem:[%s803_s6 + $0x8] sm:$0xff] %vm399_vm0, %v392_v3  ;;  %v385_v11 = vmul.f32 %v377_v4, %v377_v4  ;;  %v387_v12 = vmul.f32 %v379_v5, %v379_v5 }
  0xc4   : > { %v353_v18 = vpop.permute.xlu1 %352  ;;  %v365_v19 = vpop.permute.xlu0 %364 }
  0xc5   : > { %v393_v20 = vadd.f32 %v385_v11, %v333_v6  ;;  %v395_v21 = vadd.f32 %v387_v12, %v335_v9  ;;  %v378_v22 = vsub.f32 %v353_v18, %v785_v39  ;;  %v381_v23 = vsub.f32 %v365_v19, %v785_v39 }
  0xc7   : > { %402 = vst.msk [vmem:[%s803_s6 + $0x10] sm:$0xff] %vm399_vm0, %v393_v20  ;;  %404 = vst.msk [vmem:[%s803_s6 + $0x20] sm:$0xff] %vm399_vm0, %v395_v21  ;;  %v386_v15 = vmul.f32 %v378_v22, %v378_v22  ;;  %v389_v29 = vmul.f32 %v381_v23, %v381_v23 }
  0xc8   : > { %v361_v31 = vpop.permute.xlu1 %360 }
  0xc9   : > { %v394_v34 = vadd.f32 %v386_v15, %v334_v24  ;;  %v397_v35 = vadd.f32 %v389_v29, %v337_v26  ;;  %v380_v37 = vsub.f32 %v361_v31, %v785_v39 }
  0xcb   : > { %403 = vst.msk [vmem:[%s803_s6 + $0x18] sm:$0xff] %vm399_vm0, %v394_v34  ;;  %406 = vst.msk [vmem:[%s803_s6 + $0x30] sm:$0xff] %vm399_vm0, %v397_v35  ;;  %v388_v36 = vmul.f32 %v380_v37, %v380_v37 }
  0xcc   : > { %v369_v40 = vpop.permute.xlu1 %368 }
  0xcd   : > { %v396_v42 = vadd.f32 %v388_v36, %v336_v38  ;;  %v382_v17 = vsub.f32 %v369_v40, %v785_v39 }
  0xcf   : > { %405 = vst.msk [vmem:[%s803_s6 + $0x28] sm:$0xff] %vm399_vm0, %v396_v42  ;;  %v390_v43 = vmul.f32 %v382_v17, %v382_v17 }
  0xd1   : > { %v398_v44 = vadd.f32 %v390_v43, %v338_v32 }
  0xd3   : > { %407 = vst.msk [vmem:[%s803_s6 + $0x38] sm:$0xff] %vm399_vm0, %v398_v44 }
  0xd4   : > { %618 = shalt.err (!%p615_p5)
}
  0xd5   : > { %s619_s26 = scalar_lea.hbm %s833_s18, 1024  ;;  %s623_s29 = scalar_lea.hbm %s889_s2, 2048 }
  0xd6   : > { %p620_p6 = scmp.ne.s32.totalorder %s833_s18, %s619_s26  ;;  %p624_p10 = scmp.lt.u32.totalorder %s833_s18, %s889_s2 }
  0xd7   : > { %p625_p11 = scmp.lt.u32.totalorder %s623_s29, %s619_s26  ;;  %p627_p13 = scmp.lt.u32.totalorder %s619_s26, %s833_s18 }
  0xd8   : > { %p621_p7 = pnand %p620_p6, %p746_p4 }
  0xd9   : > { %p626_p12 = por %p625_p11, %p624_p10 }
  0xda   : > { %p622_p9 = pneg %p621_p7 }
  0xdb   : > { %p628_p0 = por %p627_p13, %p626_p12 }
  0xdd   : > { %p629_p1 = pnand %p628_p0, %p622_p9 }
  0xdf   : > { %632 = shalt.err (!%p629_p1)
}
  0xe0   : > { %s689_s4 = smov 128   ;;  %s690_s5 = smov 8  }
  0xe1   : > { %539 = dma.vmem_to_hbm [thread:$0]  (%p746_p4), %s835_s8, 1024, %s833_s18, %s841_s12, %s689_s4, %s689_s4, %s690_s5  }
  0xe2 PF: > { %p545_p2 = scmp.ge.s32.totalorder %s683_s14, 2  ;;  %s440_s6 = sand.u32 1, %s663_s9  }
  0xe3   : > { %s441_s7 = scalar_lea.sflag [#allocation3], %s440_s6 }
  0xe4   : > { %p542_p3 = pnand %p545_p2, %p753_p8 }
  0xe6   : > { %658 = dma.done.wait (!%p542_p3), %s441_s7, 1024  }
  0xe7   : > { %660 = vsyncadd (!%p542_p3), %s441_s7, 4294966272  ;;  %s15_s14 = sadd.s32 1, %s683_s14   ;;  %s892_s9 = smov %s667_s10 }
  0xe8   : > { %p12_p5 = scmp.ge.s32.totalorder %s15_s14, 4   ;;  %s893_s10 = smov %s671_s11 }
  0xe9   : > { %s894_s11 = smov %s759_s22  ;;  %s895_s12 = smov %s679_s13 }
  0xea   : > { %s896_s13 = smov %s898_s17  ;;  %14 = sbr.rel (!%p12_p5) target bundleno = 4 (0x4), region = 66 }
  0xf1   :  { %446 = vsyncpa [#allocation3], 1 }
  0xf2   :  { %448 = vsyncpa [#allocation3 + $0x1], 1 }

</bundles_post_ra>
